<compile_context>
chip_gen: v7x
topology: tpu7x:2x2x1
jax: 0.10.0
libtpu: 0.0.40
codegen_flags: <defaults>
</compile_context>

<pallas_src>
import jax
import jax.numpy as jnp
import numpy as np
from jax.experimental import pallas as pl
from jax.experimental.pallas import tpu as pltpu


def _hbm_copy_kernel(x_hbm, o_hbm, sem):
    # Whole-array HBM->HBM copy: one DMA descriptor, zero VMEM staging.
    cp = pltpu.make_async_copy(x_hbm, o_hbm, sem)
    cp.start()
    cp.wait()


def _materialized_copy(x):
    """Copy x to a fresh HBM buffer via a single direct HBM->HBM DMA."""
    total_bytes = x.size * jnp.dtype(x.dtype).itemsize
    return pl.pallas_call(
        _hbm_copy_kernel,
        out_shape=jax.ShapeDtypeStruct(x.shape, x.dtype),
        in_specs=[pl.BlockSpec(memory_space=pl.ANY)],
        out_specs=pl.BlockSpec(memory_space=pl.ANY),
        scratch_shapes=[pltpu.SemaphoreType.DMA],
        cost_estimate=pl.CostEstimate(
            flops=0,
            transcendentals=0,
            bytes_accessed=2 * total_bytes,
        ),
    )(x)


def decoder_forward(x, feature_dims, materialize=False):
    """Pallas equivalent of Decoder.forward: x.view(-1, *feature_dims).

    Default path is the free metadata reshape (0 HBM bytes), matching the
    PyTorch view semantics exactly.  Set materialize=True only if a fresh,
    physically distinct output buffer is required; that path issues one
    HBM->HBM DMA (2 * total bytes of HBM traffic, no VMEM usage).
    """
    feat = 1
    for d in feature_dims:
        feat *= d
    assert x.size % feat == 0, "input not reshapeable to (-1, *feature_dims)"

    if not materialize:
        # Pure view: reshape is a free metadata change — the roofline-optimal
        # implementation on v5e / v6e / v7x alike.
        return jnp.reshape(x, (-1, *feature_dims))

    out = _materialized_copy(x)
    # The reshape of the copy is again a free metadata change.
    return jnp.reshape(out, (-1, *feature_dims))


if __name__ == "__main__":
    # The template Encoder/Decoder carry no parameters (reset_seed only seeds
    # host RNGs); nothing to initialize beyond the input.
    key = jax.random.PRNGKey(0)
    # Small NCHW-style sensation tensor: (B, C, H, W).
    x = jax.random.normal(key, (2, 4, 16, 16), dtype=jnp.float32)
    feature_dims = x.shape[1:]  # Decoder.output_size[1:]

    x_host = np.asarray(jax.device_get(x))

    # Default (roofline-optimal) path: pure view, zero HBM traffic.
    y_view = decoder_forward(x, feature_dims)
    y_view = jax.block_until_ready(y_view)
    assert y_view.shape == (2, 4, 16, 16), y_view.shape
    assert y_view.dtype == x_host.dtype
    assert np.array_equal(np.asarray(jax.device_get(y_view)), x_host)

    # Materialized path: single HBM->HBM DMA through the Pallas kernel.
    y_copy = decoder_forward(x, feature_dims, materialize=True)
    y_copy = jax.block_until_ready(y_copy)
    assert y_copy.shape == (2, 4, 16, 16), y_copy.shape
    assert y_copy.dtype == x_host.dtype
    assert np.array_equal(np.asarray(jax.device_get(y_copy)), x_host)

    print("KERNEL_OK")
</pallas_src>

<mosaic_0001>
module attributes {stable_mosaic.version = 11 : i64} {
  func.func @_hbm_copy_kernel(%arg0: memref<2x4x16x16xf32, #tpu.memory_space<any>>, %arg1: memref<2x4x16x16xf32, #tpu.memory_space<any>>, %arg2: memref<!tpu.dma_semaphore, #tpu.memory_space<semaphore_mem>>) attributes {dimension_semantics = [], scalar_prefetch = 0 : i64, scratch_operands = 1 : i64, tpu.core_type = #tpu.core_type<tc>} {
    tpu.enqueue_dma source(%arg0 : memref<2x4x16x16xf32, #tpu.memory_space<any>>) target(%arg1 : memref<2x4x16x16xf32, #tpu.memory_space<any>>) target_semaphore(%arg2 : memref<!tpu.dma_semaphore, #tpu.memory_space<semaphore_mem>>)
    tpu.wait_dma2 semaphore(%arg2 : memref<!tpu.dma_semaphore, #tpu.memory_space<semaphore_mem>>) src(%arg0 : memref<2x4x16x16xf32, #tpu.memory_space<any>>) dst(%arg1 : memref<2x4x16x16xf32, #tpu.memory_space<any>>)
    return
  }
}

</mosaic_0001>

<bundles_post_ra>
// kernel: tpu_custom_call.1
= control target key start
LH: loop header
LB: loop body
LE: loop exit
PB: predicated region body
PF: predicated region fallthrough
CT: control target
= control target key end

     0   :  { %s36_s6 = smov [#allocation2]   ;;  %s37_s7 = smov [#allocation3]   ;;  %s55_s0 = inlined_call_operand.hbm [shape: f32[2,4,16,16], index: 0, kind: input, shape index: {}]   ;;  %s56_s1 = inlined_call_operand.hbm [shape: f32[2,4,16,16], index: 1, kind: output, shape index: {}]  }
   0x1   :  { %s38_s8 = smov 0  }
   0x2   :  { %18 = dma.general %s55_s0, 2048, %s56_s1, %s36_s6, %s37_s7, [#allocation4], %s38_s8, 0  }
   0x3   :  { %34 = dma.done.wait [#allocation2], 2048 }
   0x4   :  { %35 = vsyncadd [#allocation2], 4294965248 }
   0x5   :  { %24 = vsyncmov [#allocation2] }
   0x8   :  { %s25_s13 = vpop.sfrf %24 }
   0x9   :  { %p30_p0 = scmp.ne.s32.totalorder %s25_s13, 0 }
   0xb   :  { %29 = shalt.err (%p30_p0)  }

</bundles_post_ra>
